<compile_context>
chip_gen: v7x
topology: tpu7x:2x2x1
jax: 0.10.0
libtpu: 0.0.40
codegen_flags: <defaults>
</compile_context>

<pallas_src>
import functools

import jax
import jax.numpy as jnp
import numpy as np
from jax import lax
from jax.experimental import pallas as pl
from jax.experimental.pallas import tpu as pltpu


def _round_up(x, m):
    return (x + m - 1) // m * m


def _smha_kernel(xq_ref, xk_ref, wq_ref, wk_ref, mask_ref, out_ref, *,
                 n_heads, d_k, compute_dtype, has_mask):
    # xq_ref: [1, Lq, d_model], xk_ref: [1, Lk, d_model]   (compute_dtype)
    # wq_ref / wk_ref: [d_model, n_heads*d_k]              (compute_dtype)
    # mask_ref: [1, Lq, Lk] bf16 {0,1} (only if has_mask)
    # out_ref:  [1, n_heads, Lq, Lk] float32
    xq = xq_ref[0]            # [Lq, d_model]
    xk = xk_ref[0]            # [Lk, d_model]
    wq = wq_ref[...]          # [d_model, H*d_k]
    wk = wk_ref[...]

    # One projection per batch for ALL heads -> much better MXU column fill
    # than per-head N=d_k matmuls, and no redundant re-projection per head.
    q_all = jnp.dot(xq, wq, preferred_element_type=jnp.float32)   # [Lq, H*d_k] f32
    k_all = jnp.dot(xk, wk, preferred_element_type=jnp.float32)   # [Lk, H*d_k] f32

    # Scale Q (small) instead of scores (large); elementwise stays f32 (v5e-safe).
    scale = jnp.float32(1.0 / np.sqrt(d_k))
    q_all = (q_all * scale).astype(compute_dtype)
    k_all = k_all.astype(compute_dtype)

    if has_mask:
        # Additive bias, computed once per batch (hoisted out of the head loop).
        bias = mask_ref[0].astype(jnp.float32) * jnp.float32(-1e9)  # [Lq, Lk]

    # Short static unrolled loop over heads (n_heads is small in DSTAGNN).
    for h in range(n_heads):
        qh = q_all[:, h * d_k:(h + 1) * d_k]   # [Lq, d_k], static slice
        kh = k_all[:, h * d_k:(h + 1) * d_k]   # [Lk, d_k]
        # Contract on the last axis of both -> MXU consumes K untransposed.
        s = lax.dot_general(qh, kh, (((1,), (1,)), ((), ())),
                            preferred_element_type=jnp.float32)    # [Lq, Lk]
        if has_mask:
            s = s + bias
        out_ref[0, h] = s


def smha_forward(input_Q, input_K, W_Q, W_K, attn_mask, *, n_heads, d_k,
                 compute_dtype=jnp.bfloat16):
    """Pallas implementation of SMultiHeadAttention.forward.

    input_Q: [B, Lq, d_model]  float32
    input_K: [B, Lk, d_model]  float32
    W_Q, W_K: PyTorch-layout Linear weights [d_k * n_heads, d_model]
    attn_mask: [B, Lq, Lk] {0,1} (1 -> masked) or None
    returns: [B, n_heads, Lq, Lk] float32 (masked, scaled scores)
    """
    B, Lq, d_model = input_Q.shape
    _, Lk, _ = input_K.shape
    hd = n_heads * d_k

    # Lane-dense output: pad Lk to a multiple of 128, Lq to a multiple of 8.
    Lq_p = _round_up(Lq, 8)
    Lk_p = _round_up(Lk, 128)

    # Glue: PyTorch Linear does x @ W.T; .view(B,-1,n_heads,d_k) splits the output
    # feature axis as (head, d_k), so head h occupies columns [h*d_k:(h+1)*d_k].
    # TODO(synk): in a real model, hoist these transposes/casts out of the hot path
    # (precompute once), and fuse Wq|Wk into one matmul when input_Q is input_K.
    wq_all = jnp.transpose(W_Q, (1, 0)).astype(compute_dtype)   # [d_model, H*d_k]
    wk_all = jnp.transpose(W_K, (1, 0)).astype(compute_dtype)

    xq = input_Q.astype(compute_dtype)
    xk = input_K.astype(compute_dtype)
    if Lq_p != Lq:
        xq = jnp.pad(xq, ((0, 0), (0, Lq_p - Lq), (0, 0)))
    if Lk_p != Lk:
        xk = jnp.pad(xk, ((0, 0), (0, Lk_p - Lk), (0, 0)))

    has_mask = attn_mask is not None
    operands = [xq, xk, wq_all, wk_all]
    in_specs = [
        pl.BlockSpec((1, Lq_p, d_model), lambda b: (b, 0, 0)),    # input_Q (per batch)
        pl.BlockSpec((1, Lk_p, d_model), lambda b: (b, 0, 0)),    # input_K (per batch)
        pl.BlockSpec((d_model, hd), lambda b: (0, 0)),            # W_Q (resident)
        pl.BlockSpec((d_model, hd), lambda b: (0, 0)),            # W_K (resident)
    ]
    if has_mask:
        mask = attn_mask.astype(jnp.bfloat16)                     # {0,1}, half the DMA
        if (Lq_p != Lq) or (Lk_p != Lk):
            mask = jnp.pad(mask, ((0, 0), (0, Lq_p - Lq), (0, Lk_p - Lk)))
        operands.append(mask)
        in_specs.append(pl.BlockSpec((1, Lq_p, Lk_p), lambda b: (b, 0, 0)))
    else:
        # No-mask variant: no zeros tensor is materialized or DMA'd.
        pass

    kernel = functools.partial(
        _smha_kernel, n_heads=n_heads, d_k=d_k,
        compute_dtype=compute_dtype, has_mask=has_mask)
    if not has_mask:
        # Adapt signature: drop the mask_ref positional arg.
        base = kernel
        kernel = lambda xq_r, xk_r, wq_r, wk_r, out_r: base(
            xq_r, xk_r, wq_r, wk_r, None, out_r)

    # Conservative VMEM budget (double-buffered blocks + resident weights),
    # clamped with headroom for v7x's 64 MiB physical VMEM.
    isz = jnp.dtype(compute_dtype).itemsize
    blk_bytes = (2 * ((Lq_p + Lk_p) * d_model * isz          # inputs
                      + (Lq_p * Lk_p * 2 if has_mask else 0)  # bf16 mask
                      + n_heads * Lq_p * Lk_p * 4)            # f32 output
                 + 2 * d_model * hd * isz)                    # weights
    vmem_limit = int(min(max(2 * blk_bytes + (8 << 20), 32 << 20), 56 << 20))

    out = pl.pallas_call(
        kernel,
        out_shape=jax.ShapeDtypeStruct((B, n_heads, Lq_p, Lk_p), jnp.float32),
        grid_spec=pltpu.PrefetchScalarGridSpec(
            num_scalar_prefetch=0,
            grid=(B,),                                            # heads collapsed
            in_specs=in_specs,
            out_specs=pl.BlockSpec((1, n_heads, Lq_p, Lk_p),
                                   lambda b: (b, 0, 0, 0)),
        ),
        compiler_params=pltpu.CompilerParams(
            # TODO(synk): if B == 1 on v7x, split Lq into >=2 parallel blocks to
            # feed both TensorCores.
            dimension_semantics=("parallel",),
            vmem_limit_bytes=vmem_limit,
        ),
    )(*operands)

    if (Lq_p != Lq) or (Lk_p != Lk):
        out = out[:, :, :Lq, :Lk]
    return out


def smha_reference(input_Q, input_K, W_Q, W_K, attn_mask, *, n_heads, d_k):
    """Plain-JAX f32 reference mirroring the PyTorch module exactly."""
    B, Lq, d_model = input_Q.shape
    Q = (input_Q @ W_Q.T).reshape(B, Lq, n_heads, d_k).transpose(0, 2, 1, 3)
    K = (input_K @ W_K.T).reshape(B, -1, n_heads, d_k).transpose(0, 2, 1, 3)
    scores = jnp.einsum("bhqd,bhkd->bhqk", Q, K) / np.sqrt(d_k)
    if attn_mask is not None:
        m = attn_mask[:, None, :, :].astype(bool)
        scores = jnp.where(m, -1e9, scores)
    return scores


if __name__ == "__main__":
    # Small shapes consistent with the module's forward signature.
    B = 2
    L = 16          # len_q == len_k (number of graph nodes in DSTAGNN)
    d_model = 32
    d_k = 8
    n_heads = 4

    key = jax.random.PRNGKey(0)
    k1, k2, k3, k4, k5 = jax.random.split(key, 5)

    input_Q = jax.random.normal(k1, (B, L, d_model), dtype=jnp.float32)
    input_K = jax.random.normal(k2, (B, L, d_model), dtype=jnp.float32)
    W_Q = jax.random.normal(k3, (d_k * n_heads, d_model), dtype=jnp.float32) / np.sqrt(d_model)
    W_K = jax.random.normal(k4, (d_k * n_heads, d_model), dtype=jnp.float32) / np.sqrt(d_model)
    attn_mask = (jax.random.uniform(k5, (B, L, L)) > 0.8).astype(jnp.float32)

    ref = smha_reference(input_Q, input_K, W_Q, W_K, attn_mask,
                         n_heads=n_heads, d_k=d_k)

    # bf16-MXU path (default): relaxed tolerance vs the f32 reference.
    out_bf16 = smha_forward(input_Q, input_K, W_Q, W_K, attn_mask,
                            n_heads=n_heads, d_k=d_k,
                            compute_dtype=jnp.bfloat16)
    out_bf16 = jax.block_until_ready(out_bf16)
    assert out_bf16.shape == (B, n_heads, L, L)
    np.testing.assert_allclose(np.asarray(out_bf16), np.asarray(ref),
                               rtol=5e-2, atol=2e-1)

    # f32 path: tight tolerance.
    out_f32 = smha_forward(input_Q, input_K, W_Q, W_K, attn_mask,
                           n_heads=n_heads, d_k=d_k,
                           compute_dtype=jnp.float32)
    out_f32 = jax.block_until_ready(out_f32)
    np.testing.assert_allclose(np.asarray(out_f32), np.asarray(ref),
                               rtol=1e-5, atol=1e-4)

    # No-mask path (exercises the zero-DMA variant).
    out_nm = smha_forward(input_Q, input_K, W_Q, W_K, None,
                          n_heads=n_heads, d_k=d_k,
                          compute_dtype=jnp.float32)
    out_nm = jax.block_until_ready(out_nm)
    ref_nm = smha_reference(input_Q, input_K, W_Q, W_K, None,
                            n_heads=n_heads, d_k=d_k)
    np.testing.assert_allclose(np.asarray(out_nm), np.asarray(ref_nm),
                               rtol=1e-5, atol=1e-4)

    print("KERNEL_OK")
</pallas_src>

<mosaic_0001>
module attributes {stable_mosaic.version = 11 : i64} {
  func.func @_smha_kernel(%arg0: i32, %arg1: memref<1x16x32xbf16, #tpu.memory_space<vmem>>, %arg2: memref<1x128x32xbf16, #tpu.memory_space<vmem>>, %arg3: memref<32x32xbf16, #tpu.memory_space<vmem>>, %arg4: memref<32x32xbf16, #tpu.memory_space<vmem>>, %arg5: memref<1x16x128xbf16, #tpu.memory_space<vmem>>, %arg6: memref<1x4x16x128xf32, #tpu.memory_space<vmem>>) attributes {dimension_semantics = [#tpu.dimension_semantics<parallel>], iteration_bounds = array<i64: 2>, scalar_prefetch = 0 : i64, scratch_operands = 0 : i64, tpu.core_type = #tpu.core_type<tc>, window_params = [{transform_indices = @transform_0, window_bounds = array<i64: 1, 16, 32>}, {transform_indices = @transform_1, window_bounds = array<i64: 1, 128, 32>}, {pipeline_mode = #tpu.pipeline_mode<synchronous>, transform_indices = @transform_2, window_bounds = array<i64: 32, 32>}, {pipeline_mode = #tpu.pipeline_mode<synchronous>, transform_indices = @transform_3, window_bounds = array<i64: 32, 32>}, {transform_indices = @transform_4, window_bounds = array<i64: 1, 16, 128>}, {transform_indices = @transform_5, window_bounds = array<i64: 1, 4, 16, 128>}]} {
    %c0 = arith.constant 0 : index
    %c0_0 = arith.constant 0 : index
    %c0_1 = arith.constant 0 : index
    %0 = vector.load %arg1[%c0, %c0_0, %c0_1] : memref<1x16x32xbf16, #tpu.memory_space<vmem>>, vector<1x16x32xbf16>
    %1 = vector.shape_cast %0 : vector<1x16x32xbf16> to vector<16x32xbf16>
    %c0_2 = arith.constant 0 : index
    %c0_3 = arith.constant 0 : index
    %c0_4 = arith.constant 0 : index
    %2 = vector.load %arg2[%c0_2, %c0_3, %c0_4] : memref<1x128x32xbf16, #tpu.memory_space<vmem>>, vector<1x128x32xbf16>
    %3 = vector.shape_cast %2 : vector<1x128x32xbf16> to vector<128x32xbf16>
    %c0_5 = arith.constant 0 : index
    %c0_6 = arith.constant 0 : index
    %4 = vector.load %arg3[%c0_5, %c0_6] : memref<32x32xbf16, #tpu.memory_space<vmem>>, vector<32x32xbf16>
    %c0_7 = arith.constant 0 : index
    %c0_8 = arith.constant 0 : index
    %5 = vector.load %arg4[%c0_7, %c0_8] : memref<32x32xbf16, #tpu.memory_space<vmem>>, vector<32x32xbf16>
    %cst = arith.constant dense<0.000000e+00> : vector<16x32xf32>
    %6 = tpu.matmul %1, %4, %cst {dimension_numbers = #tpu.dot_dimension_numbers<[1], [0], [0], [1], [0, 0, 1, 1], [], []>} : vector<16x32xbf16>, vector<32x32xbf16>, vector<16x32xf32> -> vector<16x32xf32>
    %cst_9 = arith.constant dense<0.000000e+00> : vector<128x32xf32>
    %7 = tpu.matmul %3, %5, %cst_9 {dimension_numbers = #tpu.dot_dimension_numbers<[1], [0], [0], [1], [0, 0, 1, 1], [], []>} : vector<128x32xbf16>, vector<32x32xbf16>, vector<128x32xf32> -> vector<128x32xf32>
    %cst_10 = arith.constant 0.353553385 : f32
    %8 = vector.broadcast %cst_10 : f32 to vector<16x32xf32>
    %9 = arith.mulf %6, %8 : vector<16x32xf32>
    %10 = arith.truncf %9 : vector<16x32xf32> to vector<16x32xbf16>
    %11 = arith.truncf %7 : vector<128x32xf32> to vector<128x32xbf16>
    %c0_11 = arith.constant 0 : index
    %c0_12 = arith.constant 0 : index
    %c0_13 = arith.constant 0 : index
    %12 = vector.load %arg5[%c0_11, %c0_12, %c0_13] : memref<1x16x128xbf16, #tpu.memory_space<vmem>>, vector<1x16x128xbf16>
    %13 = vector.shape_cast %12 : vector<1x16x128xbf16> to vector<16x128xbf16>
    %14 = arith.extf %13 : vector<16x128xbf16> to vector<16x128xf32>
    %cst_14 = arith.constant -1.000000e+09 : f32
    %15 = vector.broadcast %cst_14 : f32 to vector<16x128xf32>
    %16 = arith.mulf %14, %15 : vector<16x128xf32>
    %17 = vector.extract_strided_slice %10 {offsets = [0, 0], sizes = [16, 8], strides = [1, 1]} : vector<16x32xbf16> to vector<16x8xbf16>
    %18 = vector.extract_strided_slice %11 {offsets = [0, 0], sizes = [128, 8], strides = [1, 1]} : vector<128x32xbf16> to vector<128x8xbf16>
    %cst_15 = arith.constant dense<0.000000e+00> : vector<16x128xf32>
    %19 = tpu.matmul %17, %18, %cst_15 {dimension_numbers = #tpu.dot_dimension_numbers<[1], [1], [0], [0], [0, 0, 1, 0], [], []>} : vector<16x8xbf16>, vector<128x8xbf16>, vector<16x128xf32> -> vector<16x128xf32>
    %20 = arith.addf %19, %16 : vector<16x128xf32>
    %c0_16 = arith.constant 0 : index
    %c0_17 = arith.constant 0 : index
    %c0_18 = arith.constant 0 : index
    %c0_19 = arith.constant 0 : index
    %21 = vector.load %arg6[%c0_16, %c0_17, %c0_18, %c0_19] : memref<1x4x16x128xf32, #tpu.memory_space<vmem>>, vector<1x1x16x128xf32>
    %22 = vector.shape_cast %21 : vector<1x1x16x128xf32> to vector<16x128xf32>
    %23 = vector.shape_cast %20 : vector<16x128xf32> to vector<1x1x16x128xf32>
    tpu.vector_store %arg6[%c0_16, %c0_17, %c0_18, %c0_19], %23 {strides = array<i32>} : memref<1x4x16x128xf32, #tpu.memory_space<vmem>>, vector<1x1x16x128xf32>,
    %24 = vector.extract_strided_slice %10 {offsets = [0, 8], sizes = [16, 8], strides = [1, 1]} : vector<16x32xbf16> to vector<16x8xbf16>
    %25 = vector.extract_strided_slice %11 {offsets = [0, 8], sizes = [128, 8], strides = [1, 1]} : vector<128x32xbf16> to vector<128x8xbf16>
    %cst_20 = arith.constant dense<0.000000e+00> : vector<16x128xf32>
    %26 = tpu.matmul %24, %25, %cst_20 {dimension_numbers = #tpu.dot_dimension_numbers<[1], [1], [0], [0], [0, 0, 1, 0], [], []>} : vector<16x8xbf16>, vector<128x8xbf16>, vector<16x128xf32> -> vector<16x128xf32>
    %27 = arith.addf %26, %16 : vector<16x128xf32>
    %c0_21 = arith.constant 0 : index
    %c1 = arith.constant 1 : index
    %c0_22 = arith.constant 0 : index
    %c0_23 = arith.constant 0 : index
    %28 = vector.load %arg6[%c0_21, %c1, %c0_22, %c0_23] : memref<1x4x16x128xf32, #tpu.memory_space<vmem>>, vector<1x1x16x128xf32>
    %29 = vector.shape_cast %28 : vector<1x1x16x128xf32> to vector<16x128xf32>
    %30 = vector.shape_cast %27 : vector<16x128xf32> to vector<1x1x16x128xf32>
    tpu.vector_store %arg6[%c0_21, %c1, %c0_22, %c0_23], %30 {strides = array<i32>} : memref<1x4x16x128xf32, #tpu.memory_space<vmem>>, vector<1x1x16x128xf32>,
    %31 = vector.extract_strided_slice %10 {offsets = [0, 16], sizes = [16, 8], strides = [1, 1]} : vector<16x32xbf16> to vector<16x8xbf16>
    %32 = vector.extract_strided_slice %11 {offsets = [0, 16], sizes = [128, 8], strides = [1, 1]} : vector<128x32xbf16> to vector<128x8xbf16>
    %cst_24 = arith.constant dense<0.000000e+00> : vector<16x128xf32>
    %33 = tpu.matmul %31, %32, %cst_24 {dimension_numbers = #tpu.dot_dimension_numbers<[1], [1], [0], [0], [0, 0, 1, 0], [], []>} : vector<16x8xbf16>, vector<128x8xbf16>, vector<16x128xf32> -> vector<16x128xf32>
    %34 = arith.addf %33, %16 : vector<16x128xf32>
    %c0_25 = arith.constant 0 : index
    %c2 = arith.constant 2 : index
    %c0_26 = arith.constant 0 : index
    %c0_27 = arith.constant 0 : index
    %35 = vector.load %arg6[%c0_25, %c2, %c0_26, %c0_27] : memref<1x4x16x128xf32, #tpu.memory_space<vmem>>, vector<1x1x16x128xf32>
    %36 = vector.shape_cast %35 : vector<1x1x16x128xf32> to vector<16x128xf32>
    %37 = vector.shape_cast %34 : vector<16x128xf32> to vector<1x1x16x128xf32>
    tpu.vector_store %arg6[%c0_25, %c2, %c0_26, %c0_27], %37 {strides = array<i32>} : memref<1x4x16x128xf32, #tpu.memory_space<vmem>>, vector<1x1x16x128xf32>,
    %38 = vector.extract_strided_slice %10 {offsets = [0, 24], sizes = [16, 8], strides = [1, 1]} : vector<16x32xbf16> to vector<16x8xbf16>
    %39 = vector.extract_strided_slice %11 {offsets = [0, 24], sizes = [128, 8], strides = [1, 1]} : vector<128x32xbf16> to vector<128x8xbf16>
    %cst_28 = arith.constant dense<0.000000e+00> : vector<16x128xf32>
    %40 = tpu.matmul %38, %39, %cst_28 {dimension_numbers = #tpu.dot_dimension_numbers<[1], [1], [0], [0], [0, 0, 1, 0], [], []>} : vector<16x8xbf16>, vector<128x8xbf16>, vector<16x128xf32> -> vector<16x128xf32>
    %41 = arith.addf %40, %16 : vector<16x128xf32>
    %c0_29 = arith.constant 0 : index
    %c3 = arith.constant 3 : index
    %c0_30 = arith.constant 0 : index
    %c0_31 = arith.constant 0 : index
    %42 = vector.load %arg6[%c0_29, %c3, %c0_30, %c0_31] : memref<1x4x16x128xf32, #tpu.memory_space<vmem>>, vector<1x1x16x128xf32>
    %43 = vector.shape_cast %42 : vector<1x1x16x128xf32> to vector<16x128xf32>
    %44 = vector.shape_cast %41 : vector<16x128xf32> to vector<1x1x16x128xf32>
    tpu.vector_store %arg6[%c0_29, %c3, %c0_30, %c0_31], %44 {strides = array<i32>} : memref<1x4x16x128xf32, #tpu.memory_space<vmem>>, vector<1x1x16x128xf32>,
    return
  }
  func.func @transform_0(%arg0: i32) -> (i32, i32, i32) {
    %c0_i32 = arith.constant 0 : i32
    %c0_i32_0 = arith.constant 0 : i32
    %c0_i32_1 = arith.constant 0 : i32
    return %arg0, %c0_i32, %c0_i32_0 : i32, i32, i32
  }
  func.func @transform_1(%arg0: i32) -> (i32, i32, i32) {
    %c0_i32 = arith.constant 0 : i32
    %c0_i32_0 = arith.constant 0 : i32
    %c0_i32_1 = arith.constant 0 : i32
    return %arg0, %c0_i32, %c0_i32_0 : i32, i32, i32
  }
  func.func @transform_2(%arg0: i32) -> (i32, i32) {
    %c0_i32 = arith.constant 0 : i32
    %c0_i32_0 = arith.constant 0 : i32
    %c0_i32_1 = arith.constant 0 : i32
    return %c0_i32, %c0_i32_0 : i32, i32
  }
  func.func @transform_3(%arg0: i32) -> (i32, i32) {
    %c0_i32 = arith.constant 0 : i32
    %c0_i32_0 = arith.constant 0 : i32
    %c0_i32_1 = arith.constant 0 : i32
    return %c0_i32, %c0_i32_0 : i32, i32
  }
  func.func @transform_4(%arg0: i32) -> (i32, i32, i32) {
    %c0_i32 = arith.constant 0 : i32
    %c0_i32_0 = arith.constant 0 : i32
    %c0_i32_1 = arith.constant 0 : i32
    return %arg0, %c0_i32, %c0_i32_0 : i32, i32, i32
  }
  func.func @transform_5(%arg0: i32) -> (i32, i32, i32, i32) {
    %c0_i32 = arith.constant 0 : i32
    %c0_i32_0 = arith.constant 0 : i32
    %c0_i32_1 = arith.constant 0 : i32
    %c0_i32_2 = arith.constant 0 : i32
    return %arg0, %c0_i32, %c0_i32_0, %c0_i32_1 : i32, i32, i32, i32
  }
}

</mosaic_0001>

<bundles_post_ra>
// kernel: tpu_custom_call.1
= control target key start
LH: loop header
LB: loop body
LE: loop exit
PB: predicated region body
PF: predicated region fallthrough
CT: control target
= control target key end

     0   :  { %10 = vsyncpa [#allocation3], 0  ;;  %s1614_s0 = inlined_call_operand.vmem [shape: bf16[2,16,32], index: 0, kind: input, shape index: {}]   ;;  %s1615_s1 = inlined_call_operand.vmem [shape: bf16[2,128,32], index: 1, kind: input, shape index: {}]   ;;  %s1616_s2 = inlined_call_operand.vmem [shape: bf16[32,32], index: 2, kind: input, shape index: {}]   ;;  %s1617_s3 = inlined_call_operand.vmem [shape: bf16[32,32], index: 3, kind: input, shape index: {}]   ;;  %s1618_s4 = inlined_call_operand.vmem [shape: bf16[2,16,128], index: 4, kind: input, shape index: {}]   ;;  %s1619_s5 = inlined_call_operand.hbm [shape: f32[2,4,16,128], index: 5, kind: output, shape index: {}]  }
   0x1   :  { %12 = vsyncpa [#allocation3 + $0x1], 0  ;;  %s1363_s18 = smov 0   ;;  %s1365_s19 = smov 0  }
   0x2   :  { %s1367_s20 = smov 0   ;;  %s1369_s21 = smov 0  }
   0x3 LB: > { %s1384_s22 = sadd.s32 4294967295, %s1323_s21   ;;  %s989_s23 = sadd.s32 4294967294, %s1323_s21   ;;  %s1323_s21 = sphi %s1369_s21, %s1625_s21   ;;  %s1319_s20 = sphi %s1367_s20, %s1624_s20   ;;  %s1315_s19 = sphi %s1365_s19, %s1623_s19   ;;  %s1311_s18 = sphi %s1363_s18, %s1622_s18  }
   0x4   : > { %s1388_s24 = sadd.s32 1, %s1323_s21   ;;  %s145_s25 = sadd.s32 1, %s1319_s20 }
   0x5   : > { %s142_s26 = ssub.s32 %s1323_s21, %s1388_s24  ;;  %p155_p0 = scmp.ne.s32.totalorder %s1319_s20, %s1315_s19 }
   0x6   : > { %p143_p1 = scmp.eq.s32.totalorder %s142_s26, 0  ;;  %p156_p2 = scmp.eq.s32.totalorder %s1384_s22, 1 }
   0x7   : > { %p161_p3 = scmp.ne.s32.totalorder %s1315_s19, %s1311_s18  ;;  %p162_p4 = scmp.eq.s32.totalorder %s989_s23, 1 }
   0x8   : > { %s1399_s27 = scalar_select %p143_p1, %s1319_s20, %s145_s25  }
   0x9   : > { %p1401_p5 = por %p156_p2, %p155_p0  ;;  %p1405_p6 = por %p162_p4, %p161_p3 }
   0xa   : > { %p992_p7 = scmp.ge.s32.totalorder %s1323_s21, 1  ;;  %p210_p8 = scmp.lt.s32.totalorder %s1323_s21, 3 }
   0xc   : > { %p211_p9 = pnand %p992_p7, %p210_p8 }
   0xd   : > { %v1248_v0 = vld [vmem:[%s1617_s3] sm:$0xff] (!%p211_p9)   ;;  %p248_p10 = scmp.lt.s32.totalorder (!%p211_p9), %s1384_s22, 1  ;;  %v1249_v1 = vld [vmem:[%s1617_s3 + $0x8] sm:$0xff] (!%p211_p9)   ;;  %v1325_v2 = vmov (!%p211_p9), 0.0   ;;  %vm1326_vm0 = vmmov (!%p211_p9), 0   ;;  %vm307_vm1 = vcmask (!%p211_p9), 261120  }
   0xe   : > { %214 = sbr.rel (%p211_p9) target bundleno = 718 (0x2ce), region = 40  ;;  %1102 = vmatprep.subr.bf16.mxu1 (!%p211_p9), %v1248_v0  ;;  %1094 = vmatprep.subr.bf16.mxu0 (!%p211_p9), %v1325_v2  ;;  %v1257_v3 = vld [vmem:[%s1616_s2] sm:$0xff] (!%p211_p9)   ;;  %v1259_v4 = vld [vmem:[%s1616_s2 + $0x8] sm:$0xff] (!%p211_p9)   ;;  %vm542_vm2 = vcmask (!%p211_p9), 64512   ;;  %s1327_s6 = smov (!%p211_p9), 120  }
   0xf   : > { %1103 = vmatpush3.bf16.msra.mxu1 (!%p211_p9), %v1248_v0  ;;  %1098 = vmatprep.mubr.msk.bf16.mxu0 (!%p211_p9), %vm1326_vm0, %v1325_v2  ;;  %s1328_s7 = smov (!%p211_p9), 104   ;;  %s1329_s8 = smov (!%p211_p9), 112  }
  0x10   : > { %1104 = vmatprep.subr.bf16.mxu1 (!%p211_p9), %v1249_v1  ;;  %1095 = vmatpush3.bf16.msra.mxu0 (!%p211_p9), %v1257_v3  ;;  %s245_s13 = sand.u32 (!%p211_p9), 1, %s1315_s19  }
  0x11   : > { %1096 = vmatprep.subr.bf16.mxu0 (!%p211_p9), %v1325_v2  ;;  %s993_s14 = sshll.u32 (!%p211_p9), %s245_s13, 6 }
  0x13   : > { %1105 = vmatpush3.bf16.msra.mxu1 (!%p211_p9), %v1249_v1 }
  0x14   : > { %1142 = vmatprep.subr.bf16.mxu1 (!%p211_p9), %v1325_v2  ;;  %1097 = vmatpush3.bf16.msra.mxu0 (!%p211_p9), %v1259_v4 }
  0x15   : > { %s1419_s9 = scalar_select %p248_p10, %s1384_s22, 1  ;;  %1122 = vmatprep.subr.bf16.mxu0 %v1325_v2 }
  0x17   : > { %s1038_s12 = sshll.u32 %s1419_s9, 6  ;;  %s1037_s23 = sshll.u32 %s1419_s9, 3 }
  0x18   : > { %s257_s15 = scalar_lea.vmem %s1615_s1, %s1038_s12  ;;  %s252_s30 = scalar_lea.vmem %s1614_s0, %s1037_s23 }
  0x19   : > { %v1250_v5 = vld [vmem:[%s257_s15] sm:$0xff]   ;;  %v1251_v6 = vld [vmem:[%s257_s15 + $0x8] sm:$0xff]   ;;  %v1252_v7 = vld [vmem:[%s257_s15 + $0x10] sm:$0xff]   ;;  %s262_s12 = scalar_lea.vmem %s1618_s4, %s1037_s23  ;;  %s1040_s9 = sshll.u32 %s1384_s22, 10 }
  0x1a   : > { %1106 = vmatprep.mubr.msk.bf16.mxu1 %vm307_vm1, %v1250_v5  ;;  %v1253_v8 = vld [vmem:[%s257_s15 + $0x18] sm:$0xff]   ;;  %v1260_v9 = vld [vmem:[%s252_s30] sm:$0xff]   ;;  %v1255_v11 = vld [vmem:[%s257_s15 + $0x28] sm:$0xff]   ;;  %s1565_s25 = scalar_lea.hbm %s1619_s5, %s1040_s9  ;;  %s1573_s22 = scalar_lea.sflag [#allocation3], %s245_s13 }
  0x1b   : > { %1107 = vmatmul.mubr.msk.bf16.vlgmr.msra.gmra.mrb[0].mxu1 %vm307_vm1, %v1251_v6  ;;  %v1254_v10 = vld [vmem:[%s257_s15 + $0x20] sm:$0xff]   ;;  %1099 = vmatmul.mubr.msk.bf16.vlgmr.msra.gmra.mrb[0].mxu0 %vm307_vm1, %v1260_v9  ;;  %v1256_v12 = vld [vmem:[%s257_s15 + $0x30] sm:$0xff]   ;;  %v1258_v13 = vld [vmem:[%s257_s15 + $0x38] sm:$0xff]   ;;  %s1552_s15 = scalar_lea.vmem [#allocation2], %s993_s14  ;;  %s1330_s30 = smov [#allocation2]  }
  0x1c   : > { %1110 = vmatprep.mubr.msk.bf16.mxu1 %vm307_vm1, %v1252_v7  ;;  %1138 = vmatprep.mubr.msk.bf16.mxu0 %vm1326_vm0, %v1325_v2  ;;  %s903_s16 = sshll.u32 %s1552_s15, 4  ;;  %s1567_s16 = int_to_ptr.vmem [resolvable:$true] %s903_s16 }
  0x1d   : > { %s1261_s26 = scalar_lea.vmem %s1567_s16, 1024 }
  0x1e   : > { %p1262_p11 = scmp.ne.s32.totalorder %s1567_s16, %s1261_s26 }
  0x20   : > { %p1263_p12 = pnand %p1262_p11, %p1401_p5 }
  0x22   : > { %p1264_p13 = pneg %p1263_p12 }
  0x23   : > { %1111 = vmatmul.mubr.msk.bf16.gmra.mrb[4].mxu1 %vm307_vm1, %v1253_v8 }
  0x24   : > { %1114 = vmatprep.mubr.msk.bf16.mxu1 %vm307_vm1, %v1254_v10 }
  0x2b   : > { %1115 = vmatmul.mubr.msk.bf16.gmra.mrb[8].mxu1 %vm307_vm1, %v1255_v11 }
  0x2c   : > { %1118 = vmatprep.mubr.msk.bf16.mxu1 %vm307_vm1, %v1256_v12 }
  0x33   : > { %1119 = vmatmul.mubr.msk.bf16.gmra.mrb[12].mxu1 %vm307_vm1, %v1258_v13 }
  0x34   : > { %1158 = vmatprep.mubr.msk.bf16.mxu1 %vm1326_vm0, %v1325_v2 }
  0xee   : > { %v1108_v14 = vpop.f32.mrb[0].mxu1  ;;  %v345_v21 = vpop.f32.mrb[0].mxu0 }
  0xef   : > { %v462_v15 = vpop.f32.mrb[1].mxu1  ;;  %v525_v22 = vmul.f32 0.35355338, %v345_v21  ;;  %v1100_v23 = vpop.f32.mrb[1].mxu0 }
  0xf0   : > { %v1109_v16 = vpop.f32.mrb[2].mxu1  ;;  %v348_v25 = vpop.f32.mrb[2].mxu0 }
  0xf1   : > { %v529_v17 = vpack.c.bf16 %v1109_v16, %v1108_v14  ;;  %v465_v18 = vpop.f32.mrb[3].mxu1  ;;  %v526_v27 = vmul.f32 0.35355338, %v348_v25  ;;  %v1101_v28 = vpop.f32.mrb[3].mxu0 }
  0xf2   : > { %v528_v19 = vpack.c.bf16 %v465_v18, %v462_v15 }
  0xf3   : > { %v527_v32 = vpack.c.bf16 %v526_v27, %v525_v22  ;;  %v550_v34 = vsel %vm542_vm2, %v529_v17, 0 }
  0xf4   : > { %624 = vrot.lane.b32.xlu0 %v528_v19, %s1327_s6  ;;  %v547_v20 = vsel %vm542_vm2, %v528_v19, 0 }
  0xf5   : > { %1123 = vmatpush3.bf16.xpose.msra.mxu0 %v547_v20 }
  0xf6   : > { %v1112_v24 = vpop.f32.mrb[4].mxu1  ;;  %1124 = vmatprep.subr.bf16.mxu0 %v1325_v2 }
  0xf7   : > { %v478_v26 = vpop.f32.mrb[5].mxu1 }
  0xf8   : > { %626 = vrot.lane.b32.xlu0 %v529_v17, %s1327_s6  ;;  %v1113_v29 = vpop.f32.mrb[6].mxu1 }
  0xf9   : > { %v531_v30 = vpack.c.bf16 %v1113_v29, %v1112_v24  ;;  %v481_v31 = vpop.f32.mrb[7].mxu1 }
  0xfa   : > { %v530_v33 = vpack.c.bf16 %v481_v31, %v478_v26 }
  0xfb   : > { %v556_v48 = vsel %vm542_vm2, %v531_v30, 0 }
  0xfc   : > { %628 = vrot.lane.b32.xlu1 %v530_v33, %s1327_s6  ;;  %v553_v41 = vsel %vm542_vm2, %v530_v33, 0 }
  0xfd   : > { %1125 = vmatpush3.bf16.xpose.msra.mxu0 %v550_v34 }
  0xfe   : > { %v1116_v35 = vpop.f32.mrb[8].mxu1  ;;  %1126 = vmatprep.subr.bf16.mxu0 %v1325_v2 }
  0xff   : > { %v494_v36 = vpop.f32.mrb[9].mxu1 }
 0x100   : > { %630 = vrot.lane.b32.xlu1 %v531_v30, %s1327_s6  ;;  %v1117_v37 = vpop.f32.mrb[10].mxu1 }
 0x101   : > { %v533_v38 = vpack.c.bf16 %v1117_v37, %v1116_v35  ;;  %v497_v39 = vpop.f32.mrb[11].mxu1 }
 0x102   : > { %v532_v40 = vpack.c.bf16 %v497_v39, %v494_v36 }
 0x103   : > { %v562_v50 = vsel %vm542_vm2, %v533_v38, 0 }
 0x104   : > { %634 = vrot.lane.b32.xlu1 %v533_v38, %s1327_s6  ;;  %632 = vrot.lane.b32.xlu0 %v532_v40, %s1327_s6  ;;  %v559_v49 = vsel %vm542_vm2, %v532_v40, 0 }
 0x105   : > { %1127 = vmatpush3.bf16.xpose.msra.mxu0 %v553_v41  ;;  %v1042_v41 = vld [vmem:[%s262_s12] sm:$0xff]  }
 0x106   : > { %v1120_v42 = vpop.f32.mrb[12].mxu1  ;;  %1128 = vmatprep.subr.bf16.mxu0 %v1325_v2 }
 0x107   : > { %v510_v43 = vpop.f32.mrb[13].mxu1 }
 0x108   : > { %v1121_v44 = vpop.f32.mrb[14].mxu1 }
 0x109   : > { %v535_v45 = vpack.c.bf16 %v1121_v44, %v1120_v42  ;;  %v513_v46 = vpop.f32.mrb[15].mxu1  ;;  %v1043_v42 = vunpack.c.l.bf16 %v1042_v41 }
 0x10a   : > { %v534_v47 = vpack.c.bf16 %v513_v46, %v510_v43  ;;  %v1044_v43 = vunpack.c.h.bf16 %v1042_v41 }
 0x10b   : > { %638 = vrot.lane.b32.xlu1 %v535_v45, %s1327_s6  ;;  %v568_v52 = vsel %vm542_vm2, %v535_v45, 0  ;;  %v540_v44 = vmul.f32 -1e+09, %v1043_v42 }
 0x10c   : > { %636 = vrot.lane.b32.xlu0 %v534_v47, %s1327_s6  ;;  %v565_v51 = vsel %vm542_vm2, %v534_v47, 0 }
 0x10d   : > { %1129 = vmatpush3.bf16.xpose.msra.mxu0 %v556_v48 }
 0x10e   : > { %1130 = vmatprep.subr.bf16.mxu0 %v1325_v2 }
 0x10f   : > { %802 = vrot.lane.b32.xlu1 %v528_v19, %s1328_s7 }
 0x110   : > { %713 = vrot.lane.b32.xlu0 %v528_v19, %s1329_s8 }
 0x113   : > { %715 = vrot.lane.b32.xlu1 %v529_v17, %s1329_s8 }
 0x114   : > { %614 = vrot.lane.b32.xlu0 %v527_v32, %s1327_s6  ;;  %s1265_s6 = sshll.u32 %s1330_s30, 4  ;;  %s1266_s6 = int_to_ptr.vmem [resolvable:$false] %s1265_s6 }
 0x115   : > { %1131 = vmatpush3.bf16.xpose.msra.mxu0 %v559_v49  ;;  %p1268_p0 = scmp.lt.s32.totalorder %s1567_s16, %s1266_s6 }
 0x116   : > { %1132 = vmatprep.subr.bf16.mxu0 %v1325_v2 }
 0x117   : > { %717 = vrot.lane.b32.xlu1 %v530_v33, %s1329_s8 }
 0x118   : > { %804 = vrot.lane.b32.xlu0 %v529_v17, %s1328_s7 }
 0x11b   : > { %719 = vrot.lane.b32.xlu1 %v531_v30, %s1329_s8 }
 0x11c   : > { %806 = vrot.lane.b32.xlu0 %v530_v33, %s1328_s7 }
 0x11d   : > { %1133 = vmatpush3.bf16.xpose.msra.mxu0 %v562_v50 }
 0x11e   : > { %1134 = vmatprep.subr.bf16.mxu0 %v1325_v2 }
 0x11f   : > { %721 = vrot.lane.b32.xlu1 %v532_v40, %s1329_s8 }
 0x120   : > { %808 = vrot.lane.b32.xlu0 %v531_v30, %s1328_s7 }
 0x123   : > { %723 = vrot.lane.b32.xlu1 %v533_v38, %s1329_s8 }
 0x124   : > { %810 = vrot.lane.b32.xlu0 %v532_v40, %s1328_s7 }
 0x125   : > { %1135 = vmatpush3.bf16.xpose.msra.mxu0 %v565_v51 }
 0x126   : > { %1136 = vmatprep.subr.bf16.mxu0 %v1325_v2 }
 0x127   : > { %725 = vrot.lane.b32.xlu1 %v534_v47, %s1329_s8 }
 0x128   : > { %812 = vrot.lane.b32.xlu0 %v533_v38, %s1328_s7 }
 0x12b   : > { %727 = vrot.lane.b32.xlu1 %v535_v45, %s1329_s8 }
 0x12c   : > { %814 = vrot.lane.b32.xlu0 %v534_v47, %s1328_s7 }
 0x12d   : > { %1137 = vmatpush3.bf16.xpose.msra.mxu0 %v568_v52 }
 0x12e   : > { %1162 = vmatprep.subr.bf16.mxu0 %v1325_v2 }
 0x12f   : > { %711 = vrot.lane.b32.xlu1 %v527_v32, %s1329_s8 }
 0x130   : > { %816 = vrot.lane.b32.xlu0 %v535_v45, %s1328_s7 }
 0x134   : > { %800 = vrot.lane.b32.xlu0 %v527_v32, %s1328_s7  ;;  %1139 = vmatmul.mubr.msk.bf16.vlgmr.msra.gmra.mrb[4].mxu0 %vm542_vm2, %v527_v32  ;;  %s1267_s7 = scalar_lea.vmem %s1266_s6, 2048 }
 0x135   : > { %1178 = vmatprep.mubr.msk.bf16.mxu0 %vm1326_vm0, %v1325_v2  ;;  %p1269_p1 = scmp.lt.s32.totalorder %s1267_s7, %s1261_s26 }
 0x137   : > { %p1270_p2 = por %p1269_p1, %p1268_p0 }
 0x139   : > { %p1271_p3 = pnand %p1270_p2, %p1264_p13 }
 0x166   : > { %v625_v53 = vpop.permute.xlu0 %624 }
 0x167   : > { %v644_v54 = vsel %vm542_vm2, %v625_v53, 0 }
 0x168   : > { %1143 = vmatpush3.bf16.xpose.msra.mxu1 %v644_v54 }
 0x169   : > { %1144 = vmatprep.subr.bf16.mxu1 %v1325_v2 }
 0x16a   : > { %v627_v55 = vpop.permute.xlu0 %626 }
 0x16b   : > { %v647_v57 = vsel %vm542_vm2, %v627_v55, 0 }
 0x16e   : > { %v629_v56 = vpop.permute.xlu1 %628 }
 0x16f   : > { %v650_v59 = vsel %vm542_vm2, %v629_v56, 0 }
 0x170   : > { %1145 = vmatpush3.bf16.xpose.msra.mxu1 %v647_v57 }
 0x171   : > { %1146 = vmatprep.subr.bf16.mxu1 %v1325_v2 }
 0x172   : > { %v631_v58 = vpop.permute.xlu1 %630 }
 0x173   : > { %v653_v0 = vsel %vm542_vm2, %v631_v58, 0 }
 0x176   : > { %v635_v60 = vpop.permute.xlu1 %634  ;;  %v633_v61 = vpop.permute.xlu0 %632 }
 0x177   : > { %v656_v5 = vsel %vm542_vm2, %v633_v61, 0  ;;  %v659_v8 = vsel %vm542_vm2, %v635_v60, 0 }
 0x178   : > { %1147 = vmatpush3.bf16.xpose.msra.mxu1 %v650_v59 }
 0x179   : > { %1148 = vmatprep.subr.bf16.mxu1 %v1325_v2 }
 0x17d   : > { %v639_v62 = vpop.permute.xlu1 %638 }
 0x17e   : > { %v637_v63 = vpop.permute.xlu0 %636  ;;  %v665_v14 = vsel %vm542_vm2, %v639_v62, 0 }
 0x17f   : > { %v662_v11 = vsel %vm542_vm2, %v637_v63, 0 }
 0x180   : > { %1149 = vmatpush3.bf16.xpose.msra.mxu1 %v653_v0 }
 0x181   : > { %1150 = vmatprep.subr.bf16.mxu1 %v1325_v2  ;;  %v803_v1 = vpop.permute.xlu1 %802 }
 0x182   : > { %v714_v3 = vpop.permute.xlu0 %713  ;;  %v822_v18 = vsel %vm542_vm2, %v803_v1, 0 }
 0x183   : > { %v733_v4 = vsel %vm542_vm2, %v714_v3, 0 }
 0x184   : > { %1163 = vmatpush3.bf16.xpose.msra.mxu0 %v733_v4 }
 0x185   : > { %1164 = vmatprep.subr.bf16.mxu0 %v1325_v2  ;;  %v716_v6 = vpop.permute.xlu1 %715 }
 0x186   : > { %v736_v7 = vsel %vm542_vm2, %v716_v6, 0  ;;  %v615_v17 = vpop.permute.xlu0 %614 }
 0x188   : > { %1151 = vmatpush3.bf16.xpose.msra.mxu1 %v656_v5 }
 0x189   : > { %1152 = vmatprep.subr.bf16.mxu1 %v1325_v2  ;;  %v718_v9 = vpop.permute.xlu1 %717 }
 0x18a   : > { %v739_v10 = vsel %vm542_vm2, %v718_v9, 0  ;;  %v805_v21 = vpop.permute.xlu0 %804 }
 0x18b   : > { %v825_v22 = vsel %vm542_vm2, %v805_v21, 0 }
 0x18c   : > { %1165 = vmatpush3.bf16.xpose.msra.mxu0 %v736_v7 }
 0x18d   : > { %1166 = vmatprep.subr.bf16.mxu0 %v1325_v2  ;;  %v720_v12 = vpop.permute.xlu1 %719 }
 0x18e   : > { %v742_v13 = vsel %vm542_vm2, %v720_v12, 0  ;;  %v807_v25 = vpop.permute.xlu0 %806 }
 0x18f   : > { %v828_v26 = vsel %vm542_vm2, %v807_v25, 0 }
 0x190   : > { %1153 = vmatpush3.bf16.xpose.msra.mxu1 %v659_v8 }
 0x191   : > { %1154 = vmatprep.subr.bf16.mxu1 %v1325_v2  ;;  %v722_v15 = vpop.permute.xlu1 %721 }
 0x192   : > { %v745_v16 = vsel %vm542_vm2, %v722_v15, 0  ;;  %v809_v29 = vpop.permute.xlu0 %808 }
 0x193   : > { %v831_v30 = vsel %vm542_vm2, %v809_v29, 0 }
 0x194   : > { %1167 = vmatpush3.bf16.xpose.msra.mxu0 %v739_v10 }
 0x195   : > { %1168 = vmatprep.subr.bf16.mxu0 %v1325_v2  ;;  %v724_v19 = vpop.permute.xlu1 %723 }
 0x196   : > { %v748_v20 = vsel %vm542_vm2, %v724_v19, 0  ;;  %v811_v32 = vpop.permute.xlu0 %810 }
 0x197   : > { %v834_v33 = vsel %vm542_vm2, %v811_v32, 0 }
 0x198   : > { %1155 = vmatpush3.bf16.xpose.msra.mxu1 %v662_v11 }
 0x199   : > { %1156 = vmatprep.subr.bf16.mxu1 %v1325_v2  ;;  %v726_v23 = vpop.permute.xlu1 %725 }
 0x19a   : > { %v751_v24 = vsel %vm542_vm2, %v726_v23, 0  ;;  %v813_v34 = vpop.permute.xlu0 %812 }
 0x19b   : > { %v837_v35 = vsel %vm542_vm2, %v813_v34, 0 }
 0x19c   : > { %1169 = vmatpush3.bf16.xpose.msra.mxu0 %v742_v13 }
 0x19d   : > { %1170 = vmatprep.subr.bf16.mxu0 %v1325_v2  ;;  %v728_v27 = vpop.permute.xlu1 %727 }
 0x19e   : > { %v754_v28 = vsel %vm542_vm2, %v728_v27, 0  ;;  %v815_v36 = vpop.permute.xlu0 %814 }
 0x19f   : > { %v840_v37 = vsel %vm542_vm2, %v815_v36, 0 }
 0x1a0   : > { %1157 = vmatpush3.bf16.xpose.msra.mxu1 %v665_v14 }
 0x1a1   : > { %1182 = vmatprep.subr.bf16.mxu1 %v1325_v2  ;;  %v712_v31 = vpop.permute.xlu1 %711 }
 0x1a2   : > { %v817_v38 = vpop.permute.xlu0 %816 }
 0x1a3   : > { %v843_v39 = vsel %vm542_vm2, %v817_v38, 0 }
 0x1a4   : > { %1171 = vmatpush3.bf16.xpose.msra.mxu0 %v745_v16 }
 0x1a5   : > { %1172 = vmatprep.subr.bf16.mxu0 %v1325_v2 }
 0x1a6   : > { %v801_v40 = vpop.permute.xlu0 %800 }
 0x1a7   : > { %1159 = vmatmul.mubr.msk.bf16.vlgmr.msra.gmra.mrb[16].mxu1 %vm542_vm2, %v615_v17 }
 0x1a8   : > { %1183 = vmatpush3.bf16.xpose.msra.mxu1 %v822_v18  ;;  %1198 = vmatprep.mubr.msk.bf16.mxu1 %vm1326_vm0, %v1325_v2 }
 0x1a9   : > { %1184 = vmatprep.subr.bf16.mxu1 %v1325_v2 }
 0x1ac   : > { %1173 = vmatpush3.bf16.xpose.msra.mxu0 %v748_v20 }
 0x1ad   : > { %1174 = vmatprep.subr.bf16.mxu0 %v1325_v2 }
 0x1b0   : > { %1185 = vmatpush3.bf16.xpose.msra.mxu1 %v825_v22 }
 0x1b1   : > { %1186 = vmatprep.subr.bf16.mxu1 %v1325_v2 }
 0x1b4   : > { %1175 = vmatpush3.bf16.xpose.msra.mxu0 %v751_v24 }
 0x1b5   : > { %1176 = vmatprep.subr.bf16.mxu0 %v1325_v2 }
 0x1b8   : > { %1187 = vmatpush3.bf16.xpose.msra.mxu1 %v828_v26 }
 0x1b9   : > { %1188 = vmatprep.subr.bf16.mxu1 %v1325_v2 }
 0x1bc   : > { %1177 = vmatpush3.bf16.xpose.msra.mxu0 %v754_v28 }
 0x1c0   : > { %1189 = vmatpush3.bf16.xpose.msra.mxu1 %v831_v30 }
 0x1c1   : > { %1190 = vmatprep.subr.bf16.mxu1 %v1325_v2 }
 0x1c3   : > { %1179 = vmatmul.mubr.msk.bf16.vlgmr.msra.gmra.mrb[8].mxu0 %vm542_vm2, %v712_v31 }
 0x1c8   : > { %1191 = vmatpush3.bf16.xpose.msra.mxu1 %v834_v33 }
 0x1c9   : > { %1192 = vmatprep.subr.bf16.mxu1 %v1325_v2 }
 0x1d0   : > { %1193 = vmatpush3.bf16.xpose.msra.mxu1 %v837_v35 }
 0x1d1   : > { %1194 = vmatprep.subr.bf16.mxu1 %v1325_v2 }
 0x1d8   : > { %1195 = vmatpush3.bf16.xpose.msra.mxu1 %v840_v37 }
 0x1d9   : > { %1196 = vmatprep.subr.bf16.mxu1 %v1325_v2  ;;  %v541_v2 = vmul.f32 -1e+09, %v1044_v43 }
 0x1e0   : > { %1197 = vmatpush3.bf16.xpose.msra.mxu1 %v843_v39 }
 0x1e7   : > { %1199 = vmatmul.mubr.msk.bf16.vlgmr.msra.gmra.mrb[20].mxu1 %vm542_vm2, %v801_v40 }
 0x207   : > { %v604_v45 = vpop.f32.mrb[4].mxu0 }
 0x208   : > { %v605_v46 = vadd.f32 %v604_v45, %v540_v44  ;;  %v1140_v47 = vpop.f32.mrb[5].mxu0 }
 0x209   : > { %v607_v48 = vpop.f32.mrb[6].mxu0 }
 0x20a   : > { %611 = vst [vmem:[%s1552_s15] sm:$0xff] %v605_v46  ;;  %v608_v49 = vadd.f32 %v607_v48, %v541_v2  ;;  %v1141_v50 = vpop.f32.mrb[7].mxu0 }
 0x20c   : > { %612 = vst [vmem:[%s1552_s15 + $0x8] sm:$0xff] %v608_v49 }
 0x27a   : > { %v701_v51 = vpop.f32.mrb[16].mxu1 }
 0x27b   : > { %v702_v52 = vadd.f32 %v701_v51, %v540_v44  ;;  %v1160_v53 = vpop.f32.mrb[17].mxu1 }
 0x27c   : > { %v704_v54 = vpop.f32.mrb[18].mxu1 }
 0x27d   : > { %1024 = vst [vmem:[%s1552_s15 + $0x10] sm:$0xff] %v702_v52  ;;  %v705_v55 = vadd.f32 %v704_v54, %v541_v2  ;;  %v1161_v56 = vpop.f32.mrb[19].mxu1 }
 0x27f   : > { %1025 = vst [vmem:[%s1552_s15 + $0x18] sm:$0xff] %v705_v55 }
 0x296   : > { %v790_v57 = vpop.f32.mrb[8].mxu0 }
 0x297   : > { %v791_v58 = vadd.f32 %v790_v57, %v540_v44  ;;  %v1180_v59 = vpop.f32.mrb[9].mxu0 }
 0x298   : > { %v793_v60 = vpop.f32.mrb[10].mxu0 }
 0x299   : > { %1027 = vst [vmem:[%s1552_s15 + $0x20] sm:$0xff] %v791_v58  ;;  %v794_v61 = vadd.f32 %v793_v60, %v541_v2  ;;  %v1181_v62 = vpop.f32.mrb[11].mxu0 }
 0x29b   : > { %1028 = vst [vmem:[%s1552_s15 + $0x28] sm:$0xff] %v794_v61 }
 0x2ba   : > { %v879_v63 = vpop.f32.mrb[20].mxu1 }
 0x2bb   : > { %v880_v0 = vadd.f32 %v879_v63, %v540_v44  ;;  %v1200_v1 = vpop.f32.mrb[21].mxu1 }
 0x2bc   : > { %v882_v3 = vpop.f32.mrb[22].mxu1 }
 0x2bd   : > { %1030 = vst [vmem:[%s1552_s15 + $0x30] sm:$0xff] %v880_v0  ;;  %v883_v4 = vadd.f32 %v882_v3, %v541_v2  ;;  %v1201_v5 = vpop.f32.mrb[23].mxu1 }
 0x2bf   : > { %1031 = vst [vmem:[%s1552_s15 + $0x38] sm:$0xff] %v883_v4 }
 0x2c0   : > { %1274 = shalt.err (!%p1271_p3)
}
 0x2c1   : > { %s1275_s8 = scalar_lea.hbm %s1565_s25, 1024  ;;  %s1279_s12 = scalar_lea.hbm %s1619_s5, 2048 }
 0x2c2   : > { %p1276_p4 = scmp.ne.s32.totalorder %s1565_s25, %s1275_s8  ;;  %p1280_p9 = scmp.lt.u32.totalorder %s1565_s25, %s1619_s5 }
 0x2c3   : > { %p1281_p10 = scmp.lt.u32.totalorder %s1279_s12, %s1275_s8  ;;  %p1283_p12 = scmp.lt.u32.totalorder %s1275_s8, %s1565_s25 }
 0x2c4   : > { %p1277_p7 = pnand %p1276_p4, %p1401_p5 }
 0x2c5   : > { %p1282_p11 = por %p1281_p10, %p1280_p9 }
 0x2c6   : > { %p1278_p8 = pneg %p1277_p7 }
 0x2c7   : > { %p1284_p13 = por %p1283_p12, %p1282_p11 }
 0x2c9   : > { %p1285_p0 = pnand %p1284_p13, %p1278_p8 }
 0x2cb   : > { %1288 = shalt.err (!%p1285_p0)
}
 0x2cc   : > { %s1331_s15 = smov 128   ;;  %s1332_s9 = smov 8  }
 0x2cd   : > { %1202 = dma.vmem_to_hbm [thread:$0]  (%p1401_p5), %s1567_s16, 1024, %s1565_s25, %s1573_s22, %s1331_s15, %s1331_s15, %s1332_s9  }
 0x2ce PF: > { %p1208_p1 = scmp.ge.s32.totalorder %s1323_s21, 2  ;;  %s918_s17 = sand.u32 1, %s1311_s18  }
 0x2cf   : > { %s919_s23 = scalar_lea.sflag [#allocation3], %s918_s17 }
 0x2d0   : > { %p1205_p2 = pnand %p1208_p1, %p1405_p6 }
 0x2d2   : > { %1306 = dma.done.wait (!%p1205_p2), %s919_s23, 1024  }
 0x2d3   : > { %1308 = vsyncadd (!%p1205_p2), %s919_s23, 4294966272  ;;  %p15_p3 = scmp.ge.s32.totalorder %s1388_s24, 4   ;;  %s1622_s18 = smov %s1315_s19 }
 0x2d4   : > { %s1623_s19 = smov %s1319_s20  ;;  %s1624_s20 = smov %s1399_s27 }
 0x2d5   : > { %s1625_s21 = smov %s1388_s24  ;;  %17 = sbr.rel (!%p15_p3) target bundleno = 3 (0x3), region = 84 }
 0x2dc   :  { %924 = vsyncpa [#allocation3], 1 }
 0x2dd   :  { %926 = vsyncpa [#allocation3 + $0x1], 1 }

</bundles_post_ra>
